<compile_context>
chip_gen: v5e
topology: v5e:2x2
jax: 0.10.0
libtpu: 0.0.40
codegen_flags: <defaults>
</compile_context>

<pallas_src>
import functools

import jax
import jax.numpy as jnp
from jax.experimental import pallas as pl
from jax.experimental.pallas import tpu as pltpu


def _softmax_gather_kernel(pred_ref, tgt_ref, prob_ref, ce_ref, *,
                           num_classes, ignore_label):
    """Per-pixel softmax probability at the GT class and per-pixel CE."""
    t = tgt_ref[0]                                       # (TH, Wp) int32

    # Pass 1: running max over classes (numerical stability).
    m = pred_ref[0, 0].astype(jnp.float32)
    for c in range(1, num_classes):
        m = jnp.maximum(m, pred_ref[0, c].astype(jnp.float32))

    # Pass 2: sum of exp and gather of the logit at the GT class.
    e_sum = jnp.zeros_like(m)
    x_t = jnp.zeros_like(m)
    for c in range(num_classes):
        xc = pred_ref[0, c].astype(jnp.float32)
        e_sum = e_sum + jnp.exp(xc - m)
        x_t = jnp.where(t == c, xc, x_t)

    valid = t != ignore_label
    inv = pl.reciprocal(e_sum, approx=True)              # EUP slot, ~free
    prob_t = jnp.minimum(jnp.exp(x_t - m) * inv, 1.0)    # clamp approx error
    # Invalid / padded pixels: prob 2.0 (can never pass `<= threshold` since
    # threshold <= 1.0) and CE 0.0 (never contributes to the sum).
    prob_ref[0] = jnp.where(valid, prob_t, 2.0)
    ce_ref[0] = jnp.where(valid, jnp.log(e_sum) + m - x_t, 0.0)


def _ohem_reduce_kernel(thr_ref, prob_ref, ce_ref, out_ref):
    """Per-sample partial sums of kept CE and kept-pixel counts."""
    @pl.when(pl.program_id(1) == 0)
    def _():
        out_ref[...] = jnp.zeros_like(out_ref)

    thr = thr_ref[0]
    kept = prob_ref[0] <= thr                            # invalid pixels are 2.0
    part_sum = jnp.sum(jnp.where(kept, ce_ref[0], 0.0))
    part_cnt = jnp.sum(kept.astype(jnp.float32))
    # Broadcast into the aligned (8,128) accumulator tile; every position holds
    # the same per-sample total, wrapper reads [..., 0, 0].
    out_ref[0, 0] += jnp.full((8, 128), part_sum, jnp.float32)
    out_ref[0, 1] += jnp.full((8, 128), part_cnt, jnp.float32)


def _round_up(x, m):
    return ((x + m - 1) // m) * m


def _pick_tile_h(num_classes, w_pad, h):
    # Keep the (1, C, TH, Wp) logits block <= ~2 MiB and every (TH, Wp) f32
    # temporary <= ~512 KiB so double-buffered blocks + in-kernel temporaries
    # stay well under the 16 MiB default scoped VMEM on v5e (and v7x's 64 MiB
    # physical VMEM).
    by_block = (2 * 1024 * 1024) // (4 * num_classes * w_pad)
    by_temp = (512 * 1024) // (4 * w_pad)
    th = max(8, min(256, by_block, by_temp))
    th = (th // 8) * 8
    th = min(th, _round_up(h, 8))
    return max(8, th)


def ohem_cross_entropy_2d(predict, target, *, ignore_label=255, thresh=0.7,
                          min_kept=100000, factor=8):
    """JAX/Pallas equivalent of OhemCrossEntropy2d.forward.

    `weight` is unused, as in the reference (the criterion is constructed
    without it)."""
    n, c, h, w = predict.shape
    assert target.shape == (n, h, w)
    target = target.astype(jnp.int32)

    w_pad = _round_up(max(w, 128), 128)                  # lane-dense last dim
    tile_h = _pick_tile_h(c, w_pad, h)
    h_pad = _round_up(h, tile_h)

    pred_p = jnp.pad(predict, ((0, 0), (0, 0), (0, h_pad - h), (0, w_pad - w)))
    tgt_p = jnp.pad(target, ((0, 0), (0, h_pad - h), (0, w_pad - w)),
                    constant_values=ignore_label)

    grid = (n, h_pad // tile_h)
    kernel1 = functools.partial(_softmax_gather_kernel,
                                num_classes=c, ignore_label=ignore_label)
    prob, ce = pl.pallas_call(
        kernel1,
        out_shape=(jax.ShapeDtypeStruct((n, h_pad, w_pad), jnp.float32),
                   jax.ShapeDtypeStruct((n, h_pad, w_pad), jnp.float32)),
        grid=grid,
        in_specs=[
            pl.BlockSpec((1, c, tile_h, w_pad), lambda i, j: (i, 0, j, 0)),
            pl.BlockSpec((1, tile_h, w_pad), lambda i, j: (i, j, 0)),
        ],
        out_specs=[
            pl.BlockSpec((1, tile_h, w_pad), lambda i, j: (i, j, 0)),
            pl.BlockSpec((1, tile_h, w_pad), lambda i, j: (i, j, 0)),
        ],
        compiler_params=pltpu.CompilerParams(
            dimension_semantics=("parallel", "parallel"),
            vmem_limit_bytes=32 * 1024 * 1024),
    )(pred_p, tgt_p)

    # ---- find_threshold: tiny data-dependent k-th smallest (JAX wrapper) ----
    # TODO(synk): scipy.ndimage.zoom (order=1 bilinear on probs, order=0 nearest
    # on labels) is approximated by strided nearest sampling of the full-res
    # GT-class probabilities; the exact scipy coordinate mapping is not
    # reproduced.
    prob_ds = prob[:, ::factor, ::factor]
    valid_ds = tgt_p[:, ::factor, ::factor] != ignore_label
    num_valid_ds = jnp.sum(valid_ds)
    min_kept_ds = min_kept // (factor * factor)

    if min_kept_ds > 0:
        cand = jnp.where(valid_ds, prob_ds, 2.0).ravel()   # invalid sort last
        k = min(min_kept_ds, cand.size) - 1
        kth = jnp.sort(cand)[k]
        thr_sel = jnp.where(kth > thresh, kth, jnp.float32(thresh))
    else:
        thr_sel = jnp.float32(thresh)
    threshold = jnp.where(min_kept_ds >= num_valid_ds,
                          jnp.float32(1.0), thr_sel).astype(jnp.float32)

    # ---- OHEM-masked cross entropy (kernel 2: per-sample partials) ----------
    partials = pl.pallas_call(
        _ohem_reduce_kernel,
        out_shape=jax.ShapeDtypeStruct((n, 2, 8, 128), jnp.float32),
        grid=grid,
        in_specs=[
            pl.BlockSpec(memory_space=pltpu.SMEM),               # threshold (1,)
            pl.BlockSpec((1, tile_h, w_pad), lambda i, j: (i, j, 0)),
            pl.BlockSpec((1, tile_h, w_pad), lambda i, j: (i, j, 0)),
        ],
        out_specs=pl.BlockSpec((1, 2, 8, 128), lambda i, j: (i, 0, 0, 0)),
        compiler_params=pltpu.CompilerParams(
            dimension_semantics=("parallel", "arbitrary"),
            vmem_limit_bytes=32 * 1024 * 1024),
    )(jnp.reshape(threshold, (1,)), prob, ce)

    loss_sum = jnp.sum(partials[:, 0, 0, 0])
    kept_cnt = jnp.sum(partials[:, 1, 0, 0])
    # CrossEntropyLoss(ignore_index=...) mean reduction over kept pixels.
    return loss_sum / kept_cnt


if __name__ == "__main__":
    key = jax.random.PRNGKey(0)
    k1, k2, k3 = jax.random.split(key, 3)
    N, C, H, W = 2, 4, 16, 16
    predict = jax.random.normal(k1, (N, C, H, W), dtype=jnp.float32)
    labels = jax.random.randint(k2, (N, H, W), 0, C, dtype=jnp.int32)
    drop = jax.random.uniform(k3, (N, H, W)) < 0.1
    target = jnp.where(drop, 255, labels).astype(jnp.int32)

    loss = ohem_cross_entropy_2d(predict, target, ignore_label=255,
                                 thresh=0.7, min_kept=100000, factor=8)
    jax.block_until_ready(loss)
    assert bool(jnp.isfinite(loss))
    print("KERNEL_OK")
</pallas_src>

<mosaic_0001>
module attributes {stable_mosaic.version = 11 : i64} {
  func.func @_softmax_gather_kernel(%arg0: i32, %arg1: i32, %arg2: memref<1x4x16x128xf32, #tpu.memory_space<vmem>>, %arg3: memref<1x16x128xi32, #tpu.memory_space<vmem>>, %arg4: memref<1x16x128xf32, #tpu.memory_space<vmem>>, %arg5: memref<1x16x128xf32, #tpu.memory_space<vmem>>) attributes {dimension_semantics = [#tpu.dimension_semantics<parallel>, #tpu.dimension_semantics<parallel>], iteration_bounds = array<i64: 2, 1>, scalar_prefetch = 0 : i64, scratch_operands = 0 : i64, tpu.core_type = #tpu.core_type<tc>, window_params = [{transform_indices = @transform_0, window_bounds = array<i64: 1, 4, 16, 128>}, {transform_indices = @transform_1, window_bounds = array<i64: 1, 16, 128>}, {transform_indices = @transform_2, window_bounds = array<i64: 1, 16, 128>}, {transform_indices = @transform_3, window_bounds = array<i64: 1, 16, 128>}]} {
    %c0 = arith.constant 0 : index
    %c0_0 = arith.constant 0 : index
    %c0_1 = arith.constant 0 : index
    %0 = vector.load %arg3[%c0, %c0_0, %c0_1] : memref<1x16x128xi32, #tpu.memory_space<vmem>>, vector<1x16x128xi32>
    %1 = vector.shape_cast %0 : vector<1x16x128xi32> to vector<16x128xi32>
    %c0_2 = arith.constant 0 : index
    %c0_3 = arith.constant 0 : index
    %c0_4 = arith.constant 0 : index
    %c0_5 = arith.constant 0 : index
    %2 = vector.load %arg2[%c0_2, %c0_3, %c0_4, %c0_5] : memref<1x4x16x128xf32, #tpu.memory_space<vmem>>, vector<1x1x16x128xf32>
    %3 = vector.shape_cast %2 : vector<1x1x16x128xf32> to vector<16x128xf32>
    %c0_6 = arith.constant 0 : index
    %c1 = arith.constant 1 : index
    %c0_7 = arith.constant 0 : index
    %c0_8 = arith.constant 0 : index
    %4 = vector.load %arg2[%c0_6, %c1, %c0_7, %c0_8] : memref<1x4x16x128xf32, #tpu.memory_space<vmem>>, vector<1x1x16x128xf32>
    %5 = vector.shape_cast %4 : vector<1x1x16x128xf32> to vector<16x128xf32>
    %6 = arith.maximumf %3, %5 : vector<16x128xf32>
    %c0_9 = arith.constant 0 : index
    %c2 = arith.constant 2 : index
    %c0_10 = arith.constant 0 : index
    %c0_11 = arith.constant 0 : index
    %7 = vector.load %arg2[%c0_9, %c2, %c0_10, %c0_11] : memref<1x4x16x128xf32, #tpu.memory_space<vmem>>, vector<1x1x16x128xf32>
    %8 = vector.shape_cast %7 : vector<1x1x16x128xf32> to vector<16x128xf32>
    %9 = arith.maximumf %6, %8 : vector<16x128xf32>
    %c0_12 = arith.constant 0 : index
    %c3 = arith.constant 3 : index
    %c0_13 = arith.constant 0 : index
    %c0_14 = arith.constant 0 : index
    %10 = vector.load %arg2[%c0_12, %c3, %c0_13, %c0_14] : memref<1x4x16x128xf32, #tpu.memory_space<vmem>>, vector<1x1x16x128xf32>
    %11 = vector.shape_cast %10 : vector<1x1x16x128xf32> to vector<16x128xf32>
    %12 = arith.maximumf %9, %11 : vector<16x128xf32>
    %cst = arith.constant 0.000000e+00 : f32
    %13 = vector.broadcast %cst : f32 to vector<16x128xf32>
    %cst_15 = arith.constant 0.000000e+00 : f32
    %14 = vector.broadcast %cst_15 : f32 to vector<16x128xf32>
    %c0_16 = arith.constant 0 : index
    %c0_17 = arith.constant 0 : index
    %c0_18 = arith.constant 0 : index
    %c0_19 = arith.constant 0 : index
    %15 = vector.load %arg2[%c0_16, %c0_17, %c0_18, %c0_19] : memref<1x4x16x128xf32, #tpu.memory_space<vmem>>, vector<1x1x16x128xf32>
    %16 = vector.shape_cast %15 : vector<1x1x16x128xf32> to vector<16x128xf32>
    %17 = arith.subf %16, %12 : vector<16x128xf32>
    %18 = math.exp %17 : vector<16x128xf32>
    %19 = arith.addf %13, %18 : vector<16x128xf32>
    %c0_i32 = arith.constant 0 : i32
    %20 = vector.broadcast %c0_i32 : i32 to vector<16x128xi32>
    %21 = arith.cmpi eq, %1, %20 : vector<16x128xi32>
    %22 = arith.select %21, %16, %14 : vector<16x128xi1>, vector<16x128xf32>
    %c0_20 = arith.constant 0 : index
    %c1_21 = arith.constant 1 : index
    %c0_22 = arith.constant 0 : index
    %c0_23 = arith.constant 0 : index
    %23 = vector.load %arg2[%c0_20, %c1_21, %c0_22, %c0_23] : memref<1x4x16x128xf32, #tpu.memory_space<vmem>>, vector<1x1x16x128xf32>
    %24 = vector.shape_cast %23 : vector<1x1x16x128xf32> to vector<16x128xf32>
    %25 = arith.subf %24, %12 : vector<16x128xf32>
    %26 = math.exp %25 : vector<16x128xf32>
    %27 = arith.addf %19, %26 : vector<16x128xf32>
    %c1_i32 = arith.constant 1 : i32
    %28 = vector.broadcast %c1_i32 : i32 to vector<16x128xi32>
    %29 = arith.cmpi eq, %1, %28 : vector<16x128xi32>
    %30 = arith.select %29, %24, %22 : vector<16x128xi1>, vector<16x128xf32>
    %c0_24 = arith.constant 0 : index
    %c2_25 = arith.constant 2 : index
    %c0_26 = arith.constant 0 : index
    %c0_27 = arith.constant 0 : index
    %31 = vector.load %arg2[%c0_24, %c2_25, %c0_26, %c0_27] : memref<1x4x16x128xf32, #tpu.memory_space<vmem>>, vector<1x1x16x128xf32>
    %32 = vector.shape_cast %31 : vector<1x1x16x128xf32> to vector<16x128xf32>
    %33 = arith.subf %32, %12 : vector<16x128xf32>
    %34 = math.exp %33 : vector<16x128xf32>
    %35 = arith.addf %27, %34 : vector<16x128xf32>
    %c2_i32 = arith.constant 2 : i32
    %36 = vector.broadcast %c2_i32 : i32 to vector<16x128xi32>
    %37 = arith.cmpi eq, %1, %36 : vector<16x128xi32>
    %38 = arith.select %37, %32, %30 : vector<16x128xi1>, vector<16x128xf32>
    %c0_28 = arith.constant 0 : index
    %c3_29 = arith.constant 3 : index
    %c0_30 = arith.constant 0 : index
    %c0_31 = arith.constant 0 : index
    %39 = vector.load %arg2[%c0_28, %c3_29, %c0_30, %c0_31] : memref<1x4x16x128xf32, #tpu.memory_space<vmem>>, vector<1x1x16x128xf32>
    %40 = vector.shape_cast %39 : vector<1x1x16x128xf32> to vector<16x128xf32>
    %41 = arith.subf %40, %12 : vector<16x128xf32>
    %42 = math.exp %41 : vector<16x128xf32>
    %43 = arith.addf %35, %42 : vector<16x128xf32>
    %c3_i32 = arith.constant 3 : i32
    %44 = vector.broadcast %c3_i32 : i32 to vector<16x128xi32>
    %45 = arith.cmpi eq, %1, %44 : vector<16x128xi32>
    %46 = arith.select %45, %40, %38 : vector<16x128xi1>, vector<16x128xf32>
    %c255_i32 = arith.constant 255 : i32
    %47 = vector.broadcast %c255_i32 : i32 to vector<16x128xi32>
    %48 = arith.cmpi ne, %1, %47 : vector<16x128xi32>
    %49 = tpu.reciprocal %43 {approx = true} : vector<16x128xf32> -> vector<16x128xf32>
    %50 = arith.subf %46, %12 : vector<16x128xf32>
    %51 = math.exp %50 : vector<16x128xf32>
    %52 = arith.mulf %51, %49 : vector<16x128xf32>
    %cst_32 = arith.constant 1.000000e+00 : f32
    %53 = vector.broadcast %cst_32 : f32 to vector<16x128xf32>
    %54 = arith.minimumf %52, %53 : vector<16x128xf32>
    %cst_33 = arith.constant 2.000000e+00 : f32
    %55 = vector.broadcast %cst_33 : f32 to vector<16x128xf32>
    %56 = arith.select %48, %54, %55 : vector<16x128xi1>, vector<16x128xf32>
    %c0_34 = arith.constant 0 : index
    %c0_35 = arith.constant 0 : index
    %c0_36 = arith.constant 0 : index
    %57 = vector.load %arg4[%c0_34, %c0_35, %c0_36] : memref<1x16x128xf32, #tpu.memory_space<vmem>>, vector<1x16x128xf32>
    %58 = vector.shape_cast %57 : vector<1x16x128xf32> to vector<16x128xf32>
    %59 = vector.shape_cast %56 : vector<16x128xf32> to vector<1x16x128xf32>
    tpu.vector_store %arg4[%c0_34, %c0_35, %c0_36], %59 {strides = array<i32>} : memref<1x16x128xf32, #tpu.memory_space<vmem>>, vector<1x16x128xf32>,
    %60 = math.log %43 : vector<16x128xf32>
    %61 = arith.addf %60, %12 : vector<16x128xf32>
    %62 = arith.subf %61, %46 : vector<16x128xf32>
    %cst_37 = arith.constant 0.000000e+00 : f32
    %63 = vector.broadcast %cst_37 : f32 to vector<16x128xf32>
    %64 = arith.select %48, %62, %63 : vector<16x128xi1>, vector<16x128xf32>
    %c0_38 = arith.constant 0 : index
    %c0_39 = arith.constant 0 : index
    %c0_40 = arith.constant 0 : index
    %65 = vector.load %arg5[%c0_38, %c0_39, %c0_40] : memref<1x16x128xf32, #tpu.memory_space<vmem>>, vector<1x16x128xf32>
    %66 = vector.shape_cast %65 : vector<1x16x128xf32> to vector<16x128xf32>
    %67 = vector.shape_cast %64 : vector<16x128xf32> to vector<1x16x128xf32>
    tpu.vector_store %arg5[%c0_38, %c0_39, %c0_40], %67 {strides = array<i32>} : memref<1x16x128xf32, #tpu.memory_space<vmem>>, vector<1x16x128xf32>,
    return
  }
  func.func @transform_0(%arg0: i32, %arg1: i32) -> (i32, i32, i32, i32) {
    %c0_i32 = arith.constant 0 : i32
    %c0_i32_0 = arith.constant 0 : i32
    %c0_i32_1 = arith.constant 0 : i32
    return %arg0, %c0_i32, %arg1, %c0_i32_0 : i32, i32, i32, i32
  }
  func.func @transform_1(%arg0: i32, %arg1: i32) -> (i32, i32, i32) {
    %c0_i32 = arith.constant 0 : i32
    %c0_i32_0 = arith.constant 0 : i32
    return %arg0, %arg1, %c0_i32 : i32, i32, i32
  }
  func.func @transform_2(%arg0: i32, %arg1: i32) -> (i32, i32, i32) {
    %c0_i32 = arith.constant 0 : i32
    %c0_i32_0 = arith.constant 0 : i32
    return %arg0, %arg1, %c0_i32 : i32, i32, i32
  }
  func.func @transform_3(%arg0: i32, %arg1: i32) -> (i32, i32, i32) {
    %c0_i32 = arith.constant 0 : i32
    %c0_i32_0 = arith.constant 0 : i32
    return %arg0, %arg1, %c0_i32 : i32, i32, i32
  }
}

</mosaic_0001>

<bundles_post_ra>
// kernel: tpu_custom_call.1
= control target key start
LH: loop header
LB: loop body
LE: loop exit
PB: predicated region body
PF: predicated region fallthrough
CT: control target
= control target key end

     0   :  { %s1127_s0 = inlined_call_operand.hbm [shape: f32[2,4,16,128], index: 0, kind: input, shape index: {}]   ;;  %s1128_s1 = inlined_call_operand.hbm [shape: s32[2,16,128], index: 1, kind: input, shape index: {}]   ;;  %s1129_s2 = inlined_call_operand.hbm [shape: f32[2,16,128], index: 2, kind: output, shape index: {0}]   ;;  %s1130_s3 = inlined_call_operand.hbm [shape: f32[2,16,128], index: 3, kind: output, shape index: {1}]  }
   0x1   :  { %1131 = sst [smem:[#allocation14_spill]] %s1127_s0 }
   0x2   :  { %9 = vsyncpa [#allocation3], 0 }
   0x3   :  { %11 = vsyncpa [#allocation3 + $0x1], 0 }
   0x4   :  { %12 = vsyncpa [#allocation6], 0 }
   0x5   :  { %14 = vsyncpa [#allocation6 + $0x1], 0 }
   0x6   :  { %15 = vsyncpa [#allocation4], 0 }
   0x7   :  { %17 = vsyncpa [#allocation4 + $0x1], 0 }
   0x8   :  { %18 = vsyncpa [#allocation9], 0 }
   0x9   :  { %20 = vsyncpa [#allocation9 + $0x1], 0  ;;  %s901_s12 = smov 0   ;;  %s903_s13 = smov 0  }
   0xa   :  { %s905_s14 = smov 0   ;;  %s907_s15 = smov 0  }
   0xb   :  { %s909_s16 = smov 0   ;;  %s911_s17 = smov 0  }
   0xc LB: > { %s560_s18 = sadd.s32 4294967295, %s875_s17   ;;  %s561_s19 = sadd.s32 4294967294, %s875_s17   ;;  %s875_s17 = sphi %s911_s17, %s26_s17   ;;  %s871_s16 = sphi %s909_s16, %s1142_s16   ;;  %s867_s15 = sphi %s907_s15, %s1141_s15   ;;  %s863_s14 = sphi %s905_s14, %s1140_s14   ;;  %s859_s13 = sphi %s903_s13, %s1139_s13   ;;  %s855_s12 = sphi %s901_s12, %s1138_s12  }
   0xd   : > { %s38_s20 = sadd.s32 1, %s871_s16  ;;  %s47_s21 = sadd.s32 1, %s863_s14 }
   0xe   : > { %p40_p0 = scmp.ge.s32.totalorder %s38_s20, 2  ;;  %p54_p1 = scmp.ne.s32.totalorder %s863_s14, %s859_s13 }
   0xf   : > { %p55_p2 = scmp.eq.s32.totalorder %s875_s17, 0  ;;  %p60_p3 = scmp.ne.s32.totalorder %s859_s13, %s855_s12 }
  0x10   : > { %s1144_s20 = smov (%p40_p0, %s38_s20), 0  ;;  %p61_p5 = scmp.eq.s32.totalorder %s560_s18, 0 }
  0x11   : > { %p942_p4 = por %p55_p2, %p54_p1  ;;  %s42_s23 = ssub.s32 %s871_s16, %s1144_s20 }
  0x12   : > { %p114_p6 = scmp.eq.s32.totalorder %s560_s18, 1  ;;  %p45_p7 = scmp.eq.s32.totalorder %s42_s23, 0 }
  0x13   : > { %p948_p8 = por %p61_p5, %p60_p3  ;;  %p120_p10 = scmp.eq.s32.totalorder %s561_s19, 1 }
  0x14   : > { %p952_p9 = por %p114_p6, %p54_p1  ;;  %p563_p12 = scmp.ge.s32.totalorder %s875_s17, 2 }
  0x15   : > { %s957_s26 = scalar_select %p45_p7, %s863_s14, %s47_s21  }
  0x16   : > { %p959_p11 = por %p120_p10, %p60_p3  ;;  %p615_p13 = scmp.lt.s32.totalorder %s875_s17, 2 }
  0x17   : > { %s966_s28 = sand.u32 1, %s863_s14   ;;  %s589_s30 = sshll.u32 %s871_s16, 6 }
  0x18   : > { %s564_s29 = sshll.u32 %s966_s28, 6  ;;  %s1136_s0 = sld [smem:[#allocation14_spill]] }
  0x19   : > { %s172_s7 = scalar_lea.vmem [#allocation2], %s564_s29  ;;  %p975_p0 = pnand %p615_p13, %p942_p4 }
  0x1a   : > { %s182_s8 = sshll.u32 %s172_s7, 4  ;;  %p570_p1 = scmp.ge.s32.totalorder %s875_s17, 1  ;;  %s183_s8 = int_to_ptr.vmem [resolvable:$true] %s182_s8 }
  0x1b   : > { %s169_s11 = scalar_lea.sflag [#allocation3], %s966_s28  ;;  %s877_s18 = smov 128  }
  0x1c   : > { %s878_s19 = smov 8   ;;  %p214_p2 = scmp.lt.s32.totalorder %s875_s17, 3 }
  0x1d   : > { %s567_s21 = sshll.u32 %s966_s28, 4  ;;  %s590_s23 = sshll.u32 %s871_s16, 4 }
  0x1e   : > { %s179_s6 = scalar_lea.hbm %s1136_s0, %s589_s30  ;;  %p215_p3 = pnand %p570_p1, %p214_p2 }
  0x1f   : > { %s180_s9 = sshll.u32 %s179_s6, 4  ;;  %s203_s22 = scalar_lea.hbm %s1128_s1, %s590_s23  ;;  %s181_s9 = int_to_ptr.hbm [resolvable:$true] %s180_s9 }
  0x20   : > { %604 = dma.hbm_to_vmem [thread:$0]  (!%p975_p0), %s181_s9, 1024, %s183_s8, %s169_s11, %s877_s18, %s877_s18, %s878_s19  }
  0x21   : > { %s196_s4 = scalar_lea.vmem [#allocation5], %s567_s21  ;;  %s204_s6 = sshll.u32 %s203_s22, 4  ;;  %s205_s6 = int_to_ptr.hbm [resolvable:$true] %s204_s6 }
  0x22   : > { %s206_s5 = sshll.u32 %s196_s4, 4  ;;  %s193_s7 = scalar_lea.sflag [#allocation6], %s966_s28  ;;  %s207_s5 = int_to_ptr.vmem [resolvable:$true] %s206_s5 }
  0x23   : > { %607 = dma.hbm_to_vmem [thread:$0]  (!%p975_p0), %s205_s6, 256, %s207_s5, %s193_s7, %s877_s18, %s877_s18, %s878_s19  }
  0x24   : > { %218 = sbr.rel (%p215_p3) target bundleno = 103 (0x67), region = 28  ;;  %s993_s8 = sand.u32 (!%p215_p3), 1, %s859_s13  }
  0x25   : > { %s571_s9 = sshll.u32 (!%p215_p3), %s993_s8, 6  ;;  %s221_s11 = scalar_lea.sflag (!%p215_p3), [#allocation3], %s993_s8 }
  0x26   : > { %s224_s0 = scalar_lea.vmem (!%p215_p3), [#allocation2], %s571_s9 }
  0x29   : > { %838 = dma.done.wait (%p948_p8), %s221_s11, 1024  }
  0x2a   : > { %840 = vsyncadd (%p948_p8), %s221_s11, 4294966272  ;;  %s1002_s28 = sshll.u32 %s993_s8, 4  ;;  %s231_s10 = scalar_lea.sflag [#allocation6], %s993_s8 }
  0x2b   : > { %s234_s18 = scalar_lea.vmem [#allocation5], %s1002_s28 }
  0x2c   : > { %842 = dma.done.wait (%p948_p8), %s231_s10, 256  }
  0x2d   : > { %844 = vsyncadd (%p948_p8), %s231_s10, 4294967040  ;;  %v1010_v0 = vld [vmem:[%s234_s18] sm:$0xff]  ;;  %v1013_v6 = vld [vmem:[%s234_s18 + $0x8] sm:$0xff]  ;;  %s260_s23 = scalar_lea.vmem [#allocation7], %s1002_s28  ;;  %s1058_s4 = scalar_lea.vmem [#allocation8], %s1002_s28 }
  0x2e   : > { %v274_v1 = vld [vmem:[%s224_s0] sm:$0xff]  ;;  %v575_v2 = vld [vmem:[%s224_s0 + $0x10] sm:$0xff]  ;;  %vm299_vm0 = vcmp.eq.s32.totalorder %v1010_v0, 0  ;;  %v275_v7 = vld [vmem:[%s224_s0 + $0x8] sm:$0xff]  ;;  %vm311_vm1 = vcmp.eq.s32.totalorder %v1010_v0, 1  ;;  %vm300_vm2 = vcmp.eq.s32.totalorder %v1013_v6, 0 }
  0x2f   : > { %v279_v3 = vmax.f32 %v274_v1, %v575_v2  ;;  %v577_v4 = vld [vmem:[%s224_s0 + $0x20] sm:$0xff]  ;;  %v579_v5 = vld [vmem:[%s224_s0 + $0x30] sm:$0xff]  ;;  %v576_v8 = vld [vmem:[%s224_s0 + $0x18] sm:$0xff]  ;;  %v301_v11 = vsel %vm299_vm0, %v274_v1, 0.0  ;;  %vm323_vm3 = vcmp.eq.s32.totalorder %v1010_v0, 2  ;;  %vm335_vm4 = vcmp.eq.s32.totalorder %v1010_v0, 3 }
  0x30   : > { %v578_v9 = vld [vmem:[%s224_s0 + $0x28] sm:$0xff]  ;;  %v280_v12 = vmax.f32 %v275_v7, %v576_v8  ;;  %v580_v15 = vld [vmem:[%s224_s0 + $0x38] sm:$0xff]  ;;  %v313_v16 = vsel %vm311_vm1, %v575_v2, %v301_v11  ;;  %v302_v22 = vsel %vm300_vm2, %v275_v7, 0.0  ;;  %vm312_vm5 = vcmp.eq.s32.totalorder %v1013_v6, 1  ;;  %s591_s0 = sshll.u32 %s867_s15, 4  ;;  %s389_s29 = sshll.u32 %s260_s23, 4  ;;  %s1061_s29 = int_to_ptr.vmem [resolvable:$true] %s389_s29 }
  0x31   : > { %v284_v10 = vmax.f32 %v279_v3, %v577_v4  ;;  %v325_v26 = vsel %vm323_vm3, %v577_v4, %v313_v16  ;;  %vm324_vm6 = vcmp.eq.s32.totalorder %v1013_v6, 2  ;;  %v314_v30 = vsel %vm312_vm5, %v576_v8, %v302_v22  ;;  %s388_s21 = scalar_lea.hbm %s1129_s2, %s591_s0  ;;  %s407_s22 = scalar_lea.hbm %s1130_s3, %s591_s0 }
  0x32   : > { %v285_v14 = vmax.f32 %v280_v12, %v578_v9  ;;  %v1035_v33 = vsel %vm335_vm4, %v579_v5, %v325_v26  ;;  %v326_v37 = vsel %vm324_vm6, %v578_v9, %v314_v30  ;;  %vm336_vm7 = vcmp.eq.s32.totalorder %v1013_v6, 3  ;;  %s408_s5 = sshll.u32 %s1058_s4, 4  ;;  %s391_s6 = sshll.u32 %s388_s21, 4  ;;  %s392_s6 = int_to_ptr.hbm [resolvable:$true] %s391_s6  ;;  %s1070_s5 = int_to_ptr.vmem [resolvable:$true] %s408_s5 }
  0x33   : > { %v1016_v13 = vmax.f32 %v284_v10, %v579_v5  ;;  %v1040_v41 = vsel %vm336_vm7, %v580_v15, %v326_v37  ;;  %vm339_vm8 = vcmp.ne.s32.totalorder %v1010_v0, 255  ;;  %vm340_vm9 = vcmp.ne.s32.totalorder %v1013_v6, 255  ;;  %s410_s7 = sshll.u32 %s407_s22, 4  ;;  %s370_s9 = scalar_lea.sflag [#allocation4], %s993_s8  ;;  %s1073_s7 = int_to_ptr.hbm [resolvable:$true] %s410_s7 }
  0x34   : > { %v1025_v21 = vmax.f32 %v285_v14, %v580_v15  ;;  %s771_s11 = sshra.s32 %s392_s6, 4  ;;  %s777_s0 = scalar_lea.hbm %s1129_s2, 32  ;;  %s772_s11 = int_to_ptr.hbm [resolvable:$true] %s771_s11 }
  0x35   : > { %v291_v17 = vsub.f32 %v274_v1, %v1016_v13  ;;  %v303_v18 = vsub.f32 %v575_v2, %v1016_v13  ;;  %v315_v19 = vsub.f32 %v577_v4, %v1016_v13  ;;  %v327_v20 = vsub.f32 %v579_v5, %v1016_v13  ;;  %s773_s28 = scalar_lea.hbm %s772_s11, 16  ;;  %p778_p7 = scmp.lt.s32.totalorder %s772_s11, %s1129_s2 }
  0x36   : > { %v292_v28 = vsub.f32 %v275_v7, %v1025_v21  ;;  %v304_v29 = vsub.f32 %v576_v8, %v1025_v21  ;;  %v316_v31 = vsub.f32 %v578_v9, %v1025_v21  ;;  %v328_v32 = vsub.f32 %v580_v15, %v1025_v21  ;;  %p774_p4 = scmp.ne.s32.totalorder %s772_s11, %s773_s28  ;;  %p779_p8 = scmp.lt.s32.totalorder %s777_s0, %s773_s28 }
  0x37   : > { %v293_v23 = vmul.f32 1.442695, %v291_v17  ;;  %v305_v24 = vmul.f32 1.442695, %v303_v18  ;;  %v317_v25 = vmul.f32 1.442695, %v315_v19  ;;  %v343_v38 = vsub.f32 %v1035_v33, %v1016_v13 }
  0x38   : > { %v329_v27 = vmul.f32 1.442695, %v327_v20  ;;  %v295_v34 = vmul.f32 1.442695, %v292_v28  ;;  %v307_v35 = vmul.f32 1.442695, %v304_v29  ;;  %v344_v47 = vsub.f32 %v1040_v41, %v1025_v21  ;;  %p775_p5 = pnand %p774_p4, %p952_p9  ;;  %p780_p10 = por %p779_p8, %p778_p7 }
  0x39   : > { %669 = vpow2.f32 %v293_v23  ;;  %v319_v36 = vmul.f32 1.442695, %v316_v31  ;;  %v331_v39 = vmul.f32 1.442695, %v328_v32  ;;  %v345_v45 = vmul.f32 1.442695, %v343_v38 }
  0x3a   : > { %671 = vpow2.f32 %v305_v24  ;;  %v347_v54 = vmul.f32 1.442695, %v344_v47  ;;  %p776_p6 = pneg %p775_p5 }
  0x3b   : > { %673 = vpow2.f32 %v317_v25 }
  0x3c   : > { %675 = vpow2.f32 %v329_v27  ;;  %p781_p13 = pnand %p780_p10, %p776_p6 }
  0x3d   : > { %677 = vpow2.f32 %v295_v34 }
  0x3e   : > { %679 = vpow2.f32 %v307_v35 }
  0x3f   : > { %v670_v40 = vpop.eup %669  ;;  %681 = vpow2.f32 %v319_v36 }
  0x40   : > { %v672_v42 = vpop.eup %671  ;;  %683 = vpow2.f32 %v331_v39 }
  0x41   : > { %v674_v43 = vpop.eup %673  ;;  %v309_v44 = vadd.f32 %v672_v42, %v670_v40  ;;  %685 = vpow2.f32 %v345_v45 }
  0x42   : > { %v676_v46 = vpop.eup %675 }
  0x43   : > { %v321_v48 = vadd.f32 %v674_v43, %v309_v44  ;;  %v678_v49 = vpop.eup %677 }
  0x44   : > { %v680_v50 = vpop.eup %679 }
  0x45   : > { %v333_v51 = vadd.f32 %v676_v46, %v321_v48  ;;  %v682_v52 = vpop.eup %681  ;;  %v310_v53 = vadd.f32 %v680_v50, %v678_v49 }
  0x46   : > { %v684_v55 = vpop.eup %683 }
  0x47   : > { %687 = vrcp.f32 %v333_v51  ;;  %v322_v56 = vadd.f32 %v682_v52, %v310_v53  ;;  %v686_v58 = vpop.eup %685 }
  0x48   : > { %689 = vlog2.f32 %v333_v51 }
  0x49   : > { %v334_v57 = vadd.f32 %v684_v55, %v322_v56  ;;  %691 = vpow2.f32 %v347_v54 }
  0x4b   : > { %693 = vrcp.f32 %v334_v57 }
  0x4c   : > { %695 = vlog2.f32 %v334_v57 }
  0x4d   : > { %v688_v59 = vpop.eup %687 }
  0x4e   : > { %v690_v60 = vpop.eup %689  ;;  %v349_v61 = vmul.f32 %v688_v59, %v686_v58 }
  0x4f   : > { %v358_v62 = vmul.f32 0.6931472, %v690_v60  ;;  %v692_v63 = vpop.eup %691 }
  0x50   : > { %v351_v1 = vmin.f32 %v349_v61, 1.0 }
  0x51   : > { %v361_v2 = vadd.f32 %v358_v62, %v1016_v13  ;;  %v694_v3 = vpop.eup %693 }
  0x52   : > { %v353_v4 = vsel %vm339_vm8, %v351_v1, 2.0  ;;  %v696_v5 = vpop.eup %695  ;;  %v350_v7 = vmul.f32 %v694_v3, %v692_v63 }
  0x53   : > { %355 = vst [vmem:[%s260_s23] sm:$0xff] %v353_v4  ;;  %v363_v8 = vsub.f32 %v361_v2, %v1035_v33  ;;  %v360_v9 = vmul.f32 0.6931472, %v696_v5 }
  0x54   : > { %v352_v10 = vmin.f32 %v350_v7, 1.0 }
  0x55   : > { %v365_v11 = vsel %vm339_vm8, %v363_v8, 0.0  ;;  %v362_v12 = vadd.f32 %v360_v9, %v1025_v21 }
  0x56   : > { %367 = vst [vmem:[%s1058_s4] sm:$0xff] %v365_v11  ;;  %v354_v13 = vsel %vm340_vm9, %v352_v10, 2.0 }
  0x57   : > { %356 = vst [vmem:[%s260_s23 + $0x8] sm:$0xff] %v354_v13  ;;  %v364_v14 = vsub.f32 %v362_v12, %v1040_v41 }
  0x58   : > { %784 = shalt.err (!%p781_p13)
}
  0x59   : > { %s879_s21 = smov 128   ;;  %s880_s23 = smov 8   ;;  %v366_v0 = vsel %vm340_vm9, %v364_v14, 0.0 }
  0x5a   : > { %597 = dma.vmem_to_hbm [thread:$0]  (%p952_p9), %s1061_s29, 256, %s392_s6, %s370_s9, %s879_s21, %s879_s21, %s880_s23  }
  0x5b   : > { %368 = vst [vmem:[%s1058_s4 + $0x8] sm:$0xff] %v366_v0  ;;  %s375_s15 = scalar_lea.sflag [#allocation9], %s993_s8  ;;  %s799_s30 = sshra.s32 %s1073_s7, 4  ;;  %s800_s30 = int_to_ptr.hbm [resolvable:$true] %s799_s30 }
  0x5c   : > { %s801_s22 = scalar_lea.hbm %s800_s30, 16  ;;  %s805_s10 = scalar_lea.hbm %s1130_s3, 32 }
  0x5d   : > { %p802_p0 = scmp.ne.s32.totalorder %s800_s30, %s801_s22  ;;  %p806_p3 = scmp.lt.s32.totalorder %s800_s30, %s1130_s3 }
  0x5e   : > { %p807_p4 = scmp.lt.s32.totalorder %s805_s10, %s801_s22 }
  0x5f   : > { %p803_p1 = pnand %p802_p0, %p952_p9 }
  0x60   : > { %p808_p5 = por %p807_p4, %p806_p3 }
  0x61   : > { %p804_p2 = pneg %p803_p1 }
  0x63   : > { %p809_p6 = pnand %p808_p5, %p804_p2 }
  0x65   : > { %812 = shalt.err (!%p809_p6)
}
  0x66   : > { %598 = dma.vmem_to_hbm [thread:$0]  (%p952_p9), %s1070_s5, 256, %s1073_s7, %s375_s15, %s879_s21, %s879_s21, %s880_s23  }
  0x67 PF: > { %s425_s8 = sand.u32 1, %s855_s12   ;;  %p609_p7 = pnand %p563_p12, %p959_p11 }
  0x68   : > { %s426_s29 = scalar_lea.sflag [#allocation4], %s425_s8 }
  0x69   : > { %p610_p8 = pneg %p609_p7 }
  0x6b   : > { %846 = dma.done.wait (%p610_p8), %s426_s29, 256  }
  0x6c   : > { %848 = vsyncadd (%p610_p8), %s426_s29, 4294967040  ;;  %s436_s4 = scalar_lea.sflag [#allocation9], %s425_s8 }
  0x6d   : > { %850 = dma.done.wait (%p610_p8), %s436_s4, 256  }
  0x6e   : > { %852 = vsyncadd (%p610_p8), %s436_s4, 4294967040  ;;  %s26_s17 = sadd.s32 1, %s875_s17   ;;  %s1138_s12 = smov %s859_s13 }
  0x6f   : > { %p23_p10 = scmp.ge.s32.totalorder %s26_s17, 4   ;;  %s1139_s13 = smov %s863_s14 }
  0x70   : > { %s1140_s14 = smov %s957_s26  ;;  %s1141_s15 = smov %s871_s16 }
  0x71   : > { %s1142_s16 = smov %s1144_s20  ;;  %25 = sbr.rel (!%p23_p10) target bundleno = 12 (0xc), region = 106 }
  0x76   :  { %442 = vsyncpa [#allocation3], 1 }
  0x77   :  { %444 = vsyncpa [#allocation3 + $0x1], 1 }
  0x78   :  { %445 = vsyncpa [#allocation6], 1 }
  0x79   :  { %447 = vsyncpa [#allocation6 + $0x1], 1 }
  0x7a   :  { %448 = vsyncpa [#allocation4], 1 }
  0x7b   :  { %450 = vsyncpa [#allocation4 + $0x1], 1 }
  0x7c   :  { %451 = vsyncpa [#allocation9], 1 }
  0x7d   :  { %453 = vsyncpa [#allocation9 + $0x1], 1 }

</bundles_post_ra>
